<compile_context>
chip_gen: v7x
topology: tpu7x:2x2x1
jax: 0.10.0
libtpu: 0.0.40
codegen_flags: <defaults>
</compile_context>

<pallas_src>
import math
import functools

import jax
import jax.numpy as jnp
from jax import lax
from jax.experimental import pallas as pl
from jax.experimental.pallas import tpu as pltpu


def _lambertw_halley(y, iters=4):
    """Principal-branch Lambert W for y >= -1/e (real), float32, elementwise.

    Piecewise initial guess + `iters` Halley iterations (cubic convergence);
    4 iterations reach float32 accuracy from this init.
    """
    e = jnp.float32(math.e)
    # series about the branch point y = -1/e
    z = jnp.maximum(y * e + 1.0, 0.0)
    p = jnp.sqrt(2.0 * z)
    w_branch = -1.0 + p * (1.0 + p * (-1.0 / 3.0 + p * (11.0 / 72.0)))
    # moderate / large-y initial guesses
    w_mid = jnp.log1p(jnp.maximum(y, 0.0))
    ly = jnp.log(jnp.maximum(y, 1e-30))
    w_big = ly - jnp.log(jnp.maximum(ly, 1e-30))
    w = jnp.where(y < 0.0, w_branch, jnp.where(y < e, w_mid, w_big))

    for _ in range(iters):  # Halley on f(w) = w * e^w - y
        ew = jnp.exp(w)
        f = w * ew - y
        wp1 = w + 1.0
        denom = ew * wp1 - (w + 2.0) * f / (2.0 * wp1)
        step = f / denom
        step = jnp.where(jnp.isfinite(step), step, 0.0)
        w = w - step
    return w


def _superloss_kernel(logits_ref, tgt_ref, out_ref,
                      colsum_ref, sigma_ref, w_ref, *,
                      tau, lam, inv_lam, inv_bs, n_total,
                      num_tiles, tm, c, targets_are_labels):
    i = pl.program_id(0)
    x = logits_ref[...].astype(jnp.float32)                  # (tm, C)

    if targets_are_labels:
        # One-hot synthesized in-kernel: ~C x fewer HBM bytes for the targets.
        lab = tgt_ref[...]                                   # (tm, 1) int32
        cols = lax.broadcasted_iota(jnp.int32, (tm, c), 1)
        t = (cols == lab).astype(jnp.float32)                # (tm, C)
    else:
        t = tgt_ref[...].astype(jnp.float32)                 # (tm, C)

    @pl.when(i == 0)
    def _init():
        colsum_ref[...] = jnp.zeros_like(colsum_ref)

    # Column partial-sums of |x - t|, kept at 8 sublanes: only VALU adds of
    # sublane-tile-aligned slices per tile; the 8->1 XLU reduce runs once in
    # finalize.  (Fallback path when tm is not a multiple of 8.)
    ad = jnp.abs(x - t)                                      # (tm, C)
    if tm % 8 == 0:
        part = ad[0:8, :]
        for r in range(8, tm, 8):                            # static, aligned
            part = part + ad[r:r + 8, :]
        colsum_ref[...] += part
    else:
        colsum_ref[0:1, :] += jnp.sum(ad, axis=0, keepdims=True)

    # Soft-label / one-hot cross entropy per row, lane-dense (1, tm).
    m = jnp.max(x, axis=-1, keepdims=True)
    lse = m + jnp.log(jnp.sum(jnp.exp(x - m), axis=-1, keepdims=True))
    li = jnp.sum(t * (lse - x), axis=-1).reshape(1, tm)

    # Lambert-W / sigma chain per tile: hides under the next tile's DMA and
    # keeps the finalize epilogue tiny.
    y = 0.5 * jnp.maximum(jnp.float32(-2.0 / math.e), (li - tau) * inv_lam)
    w = _lambertw_halley(y)                                  # (1, tm)
    sigma_ref[pl.ds(i, 1), :] = jnp.exp(-w)
    w_ref[pl.ds(i, 1), :] = w

    @pl.when(i == num_tiles - 1)
    def _finalize():
        # term2: lam * log(sigma)^2 broadcasts over all N rows; log(sigma) = -w.
        w_all = w_ref[...]                                   # (num_tiles, tm)
        term2 = lam * n_total * jnp.sum(w_all * w_all)

        # term1 = sum_{n,c} (|x - t|[n,c] - tau) * sigma[c]
        #       = sum_c (colsum[c] - N * tau) * sigma[c]   (quirky N==C bcast)
        cs = jnp.sum(colsum_ref[...], axis=0, keepdims=True) - n_total * tau
        sig_all = sigma_ref[...]                             # (num_tiles, tm)
        acc = cs[:, 0:tm] * sig_all[0:1, :]
        for j in range(1, num_tiles):   # static lane-aligned slices, 1 reduce
            acc = acc + cs[:, j * tm:(j + 1) * tm] * sig_all[j:j + 1, :]
        term1 = jnp.sum(acc)

        out_ref[0, 0] = (term1 + term2) * inv_bs


def _vmem_limit_bytes():
    """Per-generation scoped-VMEM limit: ~75% of physical, capped at 96 MiB."""
    cap = None
    try:
        cap = int(getattr(pltpu.get_tpu_info(), "vmem_capacity_bytes", 0)) or None
    except Exception:
        cap = None
    if cap is None:
        cap = 64 * 1024 * 1024          # conservative fallback (v7x physical)
    return int(min((cap * 3) // 4, 96 * 1024 * 1024))


def _choose_tm(n, c, *, bytes_per_row, vmem_limit):
    """Row-tile size: prefer multiples of 128 dividing n, sized so the
    double-buffered pipelined inputs use ~55% of the scoped VMEM limit
    (headroom left for colsum/sigma/w scratch and Mosaic-internal scratch)."""
    if n % 8 != 0:
        return n          # single full-array tile is always legal
    budget = (vmem_limit * 55) // 100
    cap = max(8, budget // (2 * bytes_per_row))
    cap = min(cap, n, 2048)
    best = 8
    for cand in range(128, cap + 1, 128):   # lane-aligned tiles first
        if n % cand == 0:
            best = cand
    if best == 8:
        for cand in range(8, cap + 1, 8):
            if n % cand == 0:
                best = cand
    return best


def super_loss(logits, targets=None, *, labels=None, C=10, lam=1.0,
               batch_size=128, tm=None):
    """SuperLoss forward.

    logits: [N, C] float.  Pass either `targets` ([N, C] soft/one-hot floats,
    matching the PyTorch module signature) or `labels` ([N] int class ids,
    ~half the HBM traffic; the one-hot is synthesized in-kernel).
    N == C is required by the module's own sigma broadcast.
    """
    N, Cdim = logits.shape
    assert (targets is None) != (labels is None), "pass exactly one of targets/labels"
    assert N == Cdim, "PyTorch broadcast (l1 - tau) * sigma requires N == C"
    assert lam != 0.0 and batch_size != 0

    use_labels = labels is not None
    if use_labels:
        second = jnp.asarray(labels, dtype=jnp.int32).reshape(N, 1)
        bytes_per_row = Cdim * logits.dtype.itemsize + 4
    else:
        assert targets.shape == (N, Cdim)
        second = targets
        bytes_per_row = Cdim * (logits.dtype.itemsize + targets.dtype.itemsize)

    vmem_limit = _vmem_limit_bytes()
    if tm is None:
        tm = _choose_tm(N, Cdim, bytes_per_row=bytes_per_row, vmem_limit=vmem_limit)
    assert N % tm == 0, "tm must divide N"
    num_tiles = N // tm
    tau = math.log(C)

    kernel = functools.partial(
        _superloss_kernel,
        tau=float(tau), lam=float(lam), inv_lam=float(1.0 / lam),
        inv_bs=float(1.0 / batch_size), n_total=float(N),
        num_tiles=num_tiles, tm=tm, c=Cdim, targets_are_labels=use_labels)

    if use_labels:
        second_spec = pl.BlockSpec((tm, 1), lambda i: (i, 0))
    else:
        second_spec = pl.BlockSpec((tm, Cdim), lambda i: (i, 0))

    bytes_accessed = (int(logits.size) * logits.dtype.itemsize
                      + int(second.size) * second.dtype.itemsize + 4)
    cost = pl.CostEstimate(
        flops=int(12 * N * Cdim + 80 * N),
        transcendentals=int(N * Cdim + 9 * N),
        bytes_accessed=int(bytes_accessed))

    out = pl.pallas_call(
        kernel,
        out_shape=jax.ShapeDtypeStruct((1, 1), jnp.float32),
        grid=(num_tiles,),
        in_specs=[pl.BlockSpec((tm, Cdim), lambda i: (i, 0)), second_spec],
        out_specs=pl.BlockSpec(memory_space=pltpu.MemorySpace.SMEM),
        scratch_shapes=[
            pltpu.VMEM((8, Cdim), jnp.float32),          # |x-t| column partials
            pltpu.VMEM((num_tiles, tm), jnp.float32),    # per-sample sigma
            pltpu.VMEM((num_tiles, tm), jnp.float32),    # per-sample w = -log(sigma)
        ],
        compiler_params=pltpu.CompilerParams(
            dimension_semantics=("arbitrary",),          # sequential accumulation
            vmem_limit_bytes=vmem_limit),
        cost_estimate=cost,
    )(logits, second)
    return out[0, 0]


def _super_loss_ref(logits, targets, *, C, lam, batch_size):
    """Plain-JAX reference (same math, outside Pallas) for a sanity check."""
    tau = math.log(C)
    x = logits.astype(jnp.float32)
    t = targets.astype(jnp.float32)
    log_softmax = x - jax.nn.logsumexp(x, axis=-1, keepdims=True)
    l_i = -jnp.sum(t * log_softmax, axis=-1)                   # [N]
    y = 0.5 * jnp.maximum(-2.0 / math.e, (l_i - tau) / lam)
    sigma = jnp.exp(-_lambertw_halley(y))                      # [N]
    loss = (jnp.abs(x - t) - tau) * sigma + lam * jnp.log(sigma) ** 2
    return jnp.sum(loss) / batch_size


if __name__ == "__main__":
    key = jax.random.PRNGKey(0)
    N = C = 16                 # small; N == C so the PyTorch broadcast is valid
    lam = 1.0
    batch_size = N

    k1, k2 = jax.random.split(key)
    logits = jax.random.normal(k1, (N, C), dtype=jnp.float32)
    labels = jax.random.randint(k2, (N,), 0, C)
    targets = jax.nn.one_hot(labels, C, dtype=jnp.float32)

    # Label path (half the HBM traffic): tm=8 -> 2 grid steps exercises
    # init / accumulate / finalize across tiles.
    loss_lab = jax.block_until_ready(
        super_loss(logits, labels=labels, C=C, lam=lam,
                   batch_size=batch_size, tm=8))

    # Soft-target path (the module's native [N, C] signature), auto tile size.
    loss_soft = jax.block_until_ready(
        super_loss(logits, targets, C=C, lam=lam, batch_size=batch_size))

    ref = _super_loss_ref(logits, targets, C=C, lam=lam, batch_size=batch_size)
    for v in (loss_lab, loss_soft):
        assert jnp.isfinite(v), "non-finite loss"
        assert jnp.allclose(v, ref, rtol=1e-4, atol=1e-4), (v, ref)

    print("KERNEL_OK")
</pallas_src>

<mosaic_0001>
module attributes {stable_mosaic.version = 11 : i64} {
  func.func @_superloss_kernel(%arg0: i32, %arg1: memref<8x16xf32, #tpu.memory_space<vmem>>, %arg2: memref<8x1xi32, #tpu.memory_space<vmem>>, %arg3: memref<1x1xf32, #tpu.memory_space<smem>>, %arg4: memref<8x16xf32, #tpu.memory_space<vmem>>, %arg5: memref<2x8xf32, #tpu.memory_space<vmem>>, %arg6: memref<2x8xf32, #tpu.memory_space<vmem>>) attributes {dimension_semantics = [#tpu.dimension_semantics<arbitrary>], iteration_bounds = array<i64: 2>, scalar_prefetch = 0 : i64, scratch_operands = 3 : i64, tpu.core_type = #tpu.core_type<tc>, window_params = [{transform_indices = @transform_0, window_bounds = array<i64: 8, 16>}, {transform_indices = @transform_1, window_bounds = array<i64: 8, 1>}, {transform_indices = @transform_2, window_bounds = array<i64: 1, 1>}]} {
    %c0 = arith.constant 0 : index
    %c0_0 = arith.constant 0 : index
    %0 = vector.load %arg1[%c0, %c0_0] : memref<8x16xf32, #tpu.memory_space<vmem>>, vector<8x16xf32>
    %c0_1 = arith.constant 0 : index
    %c0_2 = arith.constant 0 : index
    %1 = vector.load %arg2[%c0_1, %c0_2] : memref<8x1xi32, #tpu.memory_space<vmem>>, vector<8x1xi32>
    %2 = tpu.iota {dimensions = array<i32: 1>} : vector<8x16xi32>
    %3 = vector.broadcast %1 : vector<8x1xi32> to vector<8x16xi32>
    %4 = arith.cmpi eq, %2, %3 : vector<8x16xi32>
    %5 = arith.extui %4 : vector<8x16xi1> to vector<8x16xi32>
    %6 = arith.sitofp %5 : vector<8x16xi32> to vector<8x16xf32>
    %c0_i32 = arith.constant 0 : i32
    %7 = arith.cmpi eq, %arg0, %c0_i32 : i32
    %8 = arith.extui %7 : i1 to i32
    %c0_i32_3 = arith.constant 0 : i32
    %9 = arith.cmpi ne, %8, %c0_i32_3 : i32
    scf.if %9 {
      %cst_51 = arith.constant 0.000000e+00 : f32
      %158 = vector.broadcast %cst_51 : f32 to vector<8x16xf32>
      %c0_52 = arith.constant 0 : index
      %c0_53 = arith.constant 0 : index
      %159 = vector.load %arg4[%c0_52, %c0_53] : memref<8x16xf32, #tpu.memory_space<vmem>>, vector<8x16xf32>
      tpu.vector_store %arg4[%c0_52, %c0_53], %158 {strides = array<i32>} : memref<8x16xf32, #tpu.memory_space<vmem>>, vector<8x16xf32>,
    } else {
    }
    %10 = arith.subf %0, %6 : vector<8x16xf32>
    %11 = math.absf %10 : vector<8x16xf32>
    %c0_4 = arith.constant 0 : index
    %c0_5 = arith.constant 0 : index
    %12 = vector.load %arg4[%c0_4, %c0_5] : memref<8x16xf32, #tpu.memory_space<vmem>>, vector<8x16xf32>
    %13 = arith.addf %12, %11 : vector<8x16xf32>
    %c0_6 = arith.constant 0 : index
    %c0_7 = arith.constant 0 : index
    %14 = vector.load %arg4[%c0_6, %c0_7] : memref<8x16xf32, #tpu.memory_space<vmem>>, vector<8x16xf32>
    tpu.vector_store %arg4[%c0_6, %c0_7], %13 {strides = array<i32>} : memref<8x16xf32, #tpu.memory_space<vmem>>, vector<8x16xf32>,
    %cst = arith.constant dense<0xFF800000> : vector<8xf32>
    %15 = vector.multi_reduction <maximumf>, %0, %cst [1] : vector<8x16xf32> to vector<8xf32>
    %16 = vector.shape_cast %15 : vector<8xf32> to vector<8x1xf32>
    %17 = vector.broadcast %16 : vector<8x1xf32> to vector<8x16xf32>
    %18 = arith.subf %0, %17 : vector<8x16xf32>
    %19 = math.exp %18 : vector<8x16xf32>
    %cst_8 = arith.constant dense<0.000000e+00> : vector<8xf32>
    %20 = vector.multi_reduction <add>, %19, %cst_8 [1] : vector<8x16xf32> to vector<8xf32>
    %21 = vector.shape_cast %20 : vector<8xf32> to vector<8x1xf32>
    %22 = math.log %21 : vector<8x1xf32>
    %23 = arith.addf %16, %22 : vector<8x1xf32>
    %24 = vector.broadcast %23 : vector<8x1xf32> to vector<8x16xf32>
    %25 = arith.subf %24, %0 : vector<8x16xf32>
    %26 = arith.mulf %6, %25 : vector<8x16xf32>
    %cst_9 = arith.constant dense<0.000000e+00> : vector<8xf32>
    %27 = vector.multi_reduction <add>, %26, %cst_9 [1] : vector<8x16xf32> to vector<8xf32>
    %28 = vector.shape_cast %27 : vector<8xf32> to vector<1x8xf32>
    %cst_10 = arith.constant 2.77258873 : f32
    %29 = vector.broadcast %cst_10 : f32 to vector<1x8xf32>
    %30 = arith.subf %28, %29 : vector<1x8xf32>
    %cst_11 = arith.constant 1.000000e+00 : f32
    %31 = vector.broadcast %cst_11 : f32 to vector<1x8xf32>
    %32 = arith.mulf %30, %31 : vector<1x8xf32>
    %cst_12 = arith.constant -0.735758901 : f32
    %33 = vector.broadcast %cst_12 : f32 to vector<1x8xf32>
    %34 = arith.maximumf %33, %32 : vector<1x8xf32>
    %cst_13 = arith.constant 5.000000e-01 : f32
    %35 = vector.broadcast %cst_13 : f32 to vector<1x8xf32>
    %36 = arith.mulf %35, %34 : vector<1x8xf32>
    %cst_14 = arith.constant 2.71828175 : f32
    %37 = vector.broadcast %cst_14 : f32 to vector<1x8xf32>
    %38 = arith.mulf %36, %37 : vector<1x8xf32>
    %cst_15 = arith.constant 1.000000e+00 : f32
    %39 = vector.broadcast %cst_15 : f32 to vector<1x8xf32>
    %40 = arith.addf %38, %39 : vector<1x8xf32>
    %cst_16 = arith.constant 0.000000e+00 : f32
    %41 = vector.broadcast %cst_16 : f32 to vector<1x8xf32>
    %42 = arith.maximumf %40, %41 : vector<1x8xf32>
    %cst_17 = arith.constant 2.000000e+00 : f32
    %43 = vector.broadcast %cst_17 : f32 to vector<1x8xf32>
    %44 = arith.mulf %43, %42 : vector<1x8xf32>
    %45 = math.sqrt %44 : vector<1x8xf32>
    %cst_18 = arith.constant 0.152777776 : f32
    %46 = vector.broadcast %cst_18 : f32 to vector<1x8xf32>
    %47 = arith.mulf %45, %46 : vector<1x8xf32>
    %cst_19 = arith.constant -0.333333343 : f32
    %48 = vector.broadcast %cst_19 : f32 to vector<1x8xf32>
    %49 = arith.addf %48, %47 : vector<1x8xf32>
    %50 = arith.mulf %45, %49 : vector<1x8xf32>
    %cst_20 = arith.constant 1.000000e+00 : f32
    %51 = vector.broadcast %cst_20 : f32 to vector<1x8xf32>
    %52 = arith.addf %51, %50 : vector<1x8xf32>
    %53 = arith.mulf %45, %52 : vector<1x8xf32>
    %cst_21 = arith.constant -1.000000e+00 : f32
    %54 = vector.broadcast %cst_21 : f32 to vector<1x8xf32>
    %55 = arith.addf %54, %53 : vector<1x8xf32>
    %cst_22 = arith.constant 0.000000e+00 : f32
    %56 = vector.broadcast %cst_22 : f32 to vector<1x8xf32>
    %57 = arith.maximumf %36, %56 : vector<1x8xf32>
    %58 = math.log1p %57 : vector<1x8xf32>
    %cst_23 = arith.constant 1.000000e-30 : f32
    %59 = vector.broadcast %cst_23 : f32 to vector<1x8xf32>
    %60 = arith.maximumf %36, %59 : vector<1x8xf32>
    %61 = math.log %60 : vector<1x8xf32>
    %cst_24 = arith.constant 1.000000e-30 : f32
    %62 = vector.broadcast %cst_24 : f32 to vector<1x8xf32>
    %63 = arith.maximumf %61, %62 : vector<1x8xf32>
    %64 = math.log %63 : vector<1x8xf32>
    %65 = arith.subf %61, %64 : vector<1x8xf32>
    %cst_25 = arith.constant 0.000000e+00 : f32
    %66 = vector.broadcast %cst_25 : f32 to vector<1x8xf32>
    %67 = arith.cmpf olt, %36, %66 : vector<1x8xf32>
    %cst_26 = arith.constant 2.71828175 : f32
    %68 = vector.broadcast %cst_26 : f32 to vector<1x8xf32>
    %69 = arith.cmpf olt, %36, %68 : vector<1x8xf32>
    %70 = arith.select %69, %58, %65 : vector<1x8xi1>, vector<1x8xf32>
    %71 = arith.select %67, %55, %70 : vector<1x8xi1>, vector<1x8xf32>
    %72 = math.exp %71 : vector<1x8xf32>
    %73 = arith.mulf %71, %72 : vector<1x8xf32>
    %74 = arith.subf %73, %36 : vector<1x8xf32>
    %cst_27 = arith.constant 1.000000e+00 : f32
    %75 = vector.broadcast %cst_27 : f32 to vector<1x8xf32>
    %76 = arith.addf %71, %75 : vector<1x8xf32>
    %77 = arith.mulf %72, %76 : vector<1x8xf32>
    %cst_28 = arith.constant 2.000000e+00 : f32
    %78 = vector.broadcast %cst_28 : f32 to vector<1x8xf32>
    %79 = arith.addf %71, %78 : vector<1x8xf32>
    %80 = arith.mulf %79, %74 : vector<1x8xf32>
    %cst_29 = arith.constant 2.000000e+00 : f32
    %81 = vector.broadcast %cst_29 : f32 to vector<1x8xf32>
    %82 = arith.mulf %81, %76 : vector<1x8xf32>
    %83 = arith.divf %80, %82 : vector<1x8xf32>
    %84 = arith.subf %77, %83 : vector<1x8xf32>
    %85 = arith.divf %74, %84 : vector<1x8xf32>
    %86 = tpu.weird %85 : vector<1x8xf32> -> vector<1x8xi1>
    %cst_30 = arith.constant dense<true> : vector<1x8xi1>
    %87 = arith.xori %86, %cst_30 : vector<1x8xi1>
    %cst_31 = arith.constant 0.000000e+00 : f32
    %88 = vector.broadcast %cst_31 : f32 to vector<1x8xf32>
    %89 = arith.select %87, %85, %88 : vector<1x8xi1>, vector<1x8xf32>
    %90 = arith.subf %71, %89 : vector<1x8xf32>
    %91 = math.exp %90 : vector<1x8xf32>
    %92 = arith.mulf %90, %91 : vector<1x8xf32>
    %93 = arith.subf %92, %36 : vector<1x8xf32>
    %cst_32 = arith.constant 1.000000e+00 : f32
    %94 = vector.broadcast %cst_32 : f32 to vector<1x8xf32>
    %95 = arith.addf %90, %94 : vector<1x8xf32>
    %96 = arith.mulf %91, %95 : vector<1x8xf32>
    %cst_33 = arith.constant 2.000000e+00 : f32
    %97 = vector.broadcast %cst_33 : f32 to vector<1x8xf32>
    %98 = arith.addf %90, %97 : vector<1x8xf32>
    %99 = arith.mulf %98, %93 : vector<1x8xf32>
    %cst_34 = arith.constant 2.000000e+00 : f32
    %100 = vector.broadcast %cst_34 : f32 to vector<1x8xf32>
    %101 = arith.mulf %100, %95 : vector<1x8xf32>
    %102 = arith.divf %99, %101 : vector<1x8xf32>
    %103 = arith.subf %96, %102 : vector<1x8xf32>
    %104 = arith.divf %93, %103 : vector<1x8xf32>
    %105 = tpu.weird %104 : vector<1x8xf32> -> vector<1x8xi1>
    %cst_35 = arith.constant dense<true> : vector<1x8xi1>
    %106 = arith.xori %105, %cst_35 : vector<1x8xi1>
    %cst_36 = arith.constant 0.000000e+00 : f32
    %107 = vector.broadcast %cst_36 : f32 to vector<1x8xf32>
    %108 = arith.select %106, %104, %107 : vector<1x8xi1>, vector<1x8xf32>
    %109 = arith.subf %90, %108 : vector<1x8xf32>
    %110 = math.exp %109 : vector<1x8xf32>
    %111 = arith.mulf %109, %110 : vector<1x8xf32>
    %112 = arith.subf %111, %36 : vector<1x8xf32>
    %cst_37 = arith.constant 1.000000e+00 : f32
    %113 = vector.broadcast %cst_37 : f32 to vector<1x8xf32>
    %114 = arith.addf %109, %113 : vector<1x8xf32>
    %115 = arith.mulf %110, %114 : vector<1x8xf32>
    %cst_38 = arith.constant 2.000000e+00 : f32
    %116 = vector.broadcast %cst_38 : f32 to vector<1x8xf32>
    %117 = arith.addf %109, %116 : vector<1x8xf32>
    %118 = arith.mulf %117, %112 : vector<1x8xf32>
    %cst_39 = arith.constant 2.000000e+00 : f32
    %119 = vector.broadcast %cst_39 : f32 to vector<1x8xf32>
    %120 = arith.mulf %119, %114 : vector<1x8xf32>
    %121 = arith.divf %118, %120 : vector<1x8xf32>
    %122 = arith.subf %115, %121 : vector<1x8xf32>
    %123 = arith.divf %112, %122 : vector<1x8xf32>
    %124 = tpu.weird %123 : vector<1x8xf32> -> vector<1x8xi1>
    %cst_40 = arith.constant dense<true> : vector<1x8xi1>
    %125 = arith.xori %124, %cst_40 : vector<1x8xi1>
    %cst_41 = arith.constant 0.000000e+00 : f32
    %126 = vector.broadcast %cst_41 : f32 to vector<1x8xf32>
    %127 = arith.select %125, %123, %126 : vector<1x8xi1>, vector<1x8xf32>
    %128 = arith.subf %109, %127 : vector<1x8xf32>
    %129 = math.exp %128 : vector<1x8xf32>
    %130 = arith.mulf %128, %129 : vector<1x8xf32>
    %131 = arith.subf %130, %36 : vector<1x8xf32>
    %cst_42 = arith.constant 1.000000e+00 : f32
    %132 = vector.broadcast %cst_42 : f32 to vector<1x8xf32>
    %133 = arith.addf %128, %132 : vector<1x8xf32>
    %134 = arith.mulf %129, %133 : vector<1x8xf32>
    %cst_43 = arith.constant 2.000000e+00 : f32
    %135 = vector.broadcast %cst_43 : f32 to vector<1x8xf32>
    %136 = arith.addf %128, %135 : vector<1x8xf32>
    %137 = arith.mulf %136, %131 : vector<1x8xf32>
    %cst_44 = arith.constant 2.000000e+00 : f32
    %138 = vector.broadcast %cst_44 : f32 to vector<1x8xf32>
    %139 = arith.mulf %138, %133 : vector<1x8xf32>
    %140 = arith.divf %137, %139 : vector<1x8xf32>
    %141 = arith.subf %134, %140 : vector<1x8xf32>
    %142 = arith.divf %131, %141 : vector<1x8xf32>
    %143 = tpu.weird %142 : vector<1x8xf32> -> vector<1x8xi1>
    %cst_45 = arith.constant dense<true> : vector<1x8xi1>
    %144 = arith.xori %143, %cst_45 : vector<1x8xi1>
    %cst_46 = arith.constant 0.000000e+00 : f32
    %145 = vector.broadcast %cst_46 : f32 to vector<1x8xf32>
    %146 = arith.select %144, %142, %145 : vector<1x8xi1>, vector<1x8xf32>
    %147 = arith.subf %128, %146 : vector<1x8xf32>
    %cst_47 = arith.constant 0.000000e+00 : f32
    %148 = vector.broadcast %cst_47 : f32 to vector<1x8xf32>
    %149 = arith.subf %148, %147 : vector<1x8xf32>
    %150 = math.exp %149 : vector<1x8xf32>
    %151 = arith.index_cast %arg0 : i32 to index
    %c0_48 = arith.constant 0 : index
    %152 = vector.load %arg5[%151, %c0_48] : memref<2x8xf32, #tpu.memory_space<vmem>>, vector<1x8xf32>
    tpu.vector_store %arg5[%151, %c0_48], %150 {strides = array<i32>} : memref<2x8xf32, #tpu.memory_space<vmem>>, vector<1x8xf32>,
    %153 = arith.index_cast %arg0 : i32 to index
    %c0_49 = arith.constant 0 : index
    %154 = vector.load %arg6[%153, %c0_49] : memref<2x8xf32, #tpu.memory_space<vmem>>, vector<1x8xf32>
    tpu.vector_store %arg6[%153, %c0_49], %147 {strides = array<i32>} : memref<2x8xf32, #tpu.memory_space<vmem>>, vector<1x8xf32>,
    %c1_i32 = arith.constant 1 : i32
    %155 = arith.cmpi eq, %arg0, %c1_i32 : i32
    %156 = arith.extui %155 : i1 to i32
    %c0_i32_50 = arith.constant 0 : i32
    %157 = arith.cmpi ne, %156, %c0_i32_50 : i32
    scf.if %157 {
      %c0_51 = arith.constant 0 : index
      %c0_52 = arith.constant 0 : index
      %158 = vector.load %arg6[%c0_51, %c0_52] : memref<2x8xf32, #tpu.memory_space<vmem>>, vector<2x8xf32>
      %159 = arith.mulf %158, %158 : vector<2x8xf32>
      %160 = vector.shape_cast %159 : vector<2x8xf32> to vector<1x2x8xf32>
      %cst_53 = arith.constant dense<0.000000e+00> : vector<1xf32>
      %161 = vector.multi_reduction <add>, %160, %cst_53 [1, 2] : vector<1x2x8xf32> to vector<1xf32>
      %162 = vector.shape_cast %161 : vector<1xf32> to vector<1x1x1xf32>
      %163 = vector.extract %162[0, 0, 0] : f32 from vector<1x1x1xf32>
      %cst_54 = arith.constant 1.600000e+01 : f32
      %164 = arith.mulf %cst_54, %163 : f32
      %c0_55 = arith.constant 0 : index
      %c0_56 = arith.constant 0 : index
      %165 = vector.load %arg4[%c0_55, %c0_56] : memref<8x16xf32, #tpu.memory_space<vmem>>, vector<8x16xf32>
      %cst_57 = arith.constant dense<0.000000e+00> : vector<16xf32>
      %166 = vector.multi_reduction <add>, %165, %cst_57 [0] : vector<8x16xf32> to vector<16xf32>
      %167 = vector.shape_cast %166 : vector<16xf32> to vector<1x16xf32>
      %cst_58 = arith.constant 44.3614197 : f32
      %168 = vector.broadcast %cst_58 : f32 to vector<1x16xf32>
      %169 = arith.subf %167, %168 : vector<1x16xf32>
      %c0_59 = arith.constant 0 : index
      %c0_60 = arith.constant 0 : index
      %170 = vector.load %arg5[%c0_59, %c0_60] : memref<2x8xf32, #tpu.memory_space<vmem>>, vector<2x8xf32>
      %171 = vector.extract_strided_slice %169 {offsets = [0, 0], sizes = [1, 8], strides = [1, 1]} : vector<1x16xf32> to vector<1x8xf32>
      %172 = vector.extract_strided_slice %170 {offsets = [0, 0], sizes = [1, 8], strides = [1, 1]} : vector<2x8xf32> to vector<1x8xf32>
      %173 = arith.mulf %171, %172 : vector<1x8xf32>
      %174 = vector.extract_strided_slice %169 {offsets = [0, 8], sizes = [1, 8], strides = [1, 1]} : vector<1x16xf32> to vector<1x8xf32>
      %175 = vector.extract_strided_slice %170 {offsets = [1, 0], sizes = [1, 8], strides = [1, 1]} : vector<2x8xf32> to vector<1x8xf32>
      %176 = arith.mulf %174, %175 : vector<1x8xf32>
      %177 = arith.addf %173, %176 : vector<1x8xf32>
      %178 = vector.shape_cast %177 : vector<1x8xf32> to vector<1x1x8xf32>
      %cst_61 = arith.constant dense<0.000000e+00> : vector<1xf32>
      %179 = vector.multi_reduction <add>, %178, %cst_61 [1, 2] : vector<1x1x8xf32> to vector<1xf32>
      %180 = vector.shape_cast %179 : vector<1xf32> to vector<1x1x1xf32>
      %181 = vector.extract %180[0, 0, 0] : f32 from vector<1x1x1xf32>
      %182 = arith.addf %181, %164 : f32
      %cst_62 = arith.constant 6.250000e-02 : f32
      %183 = arith.mulf %182, %cst_62 : f32
      %c0_63 = arith.constant 0 : index
      %c0_64 = arith.constant 0 : index
      %184 = memref.load %arg3[%c0_63, %c0_64] : memref<1x1xf32, #tpu.memory_space<smem>>
      memref.store %183, %arg3[%c0_63, %c0_64] : memref<1x1xf32, #tpu.memory_space<smem>>
    } else {
    }
    return
  }
  func.func @transform_0(%arg0: i32) -> (i32, i32) {
    %c0_i32 = arith.constant 0 : i32
    %c0_i32_0 = arith.constant 0 : i32
    return %arg0, %c0_i32 : i32, i32
  }
  func.func @transform_1(%arg0: i32) -> (i32, i32) {
    %c0_i32 = arith.constant 0 : i32
    %c0_i32_0 = arith.constant 0 : i32
    return %arg0, %c0_i32 : i32, i32
  }
  func.func @transform_2(%arg0: i32) -> (i32, i32) {
    %c0_i32 = arith.constant 0 : i32
    %c0_i32_0 = arith.constant 0 : i32
    %c0_i32_1 = arith.constant 0 : i32
    return %c0_i32, %c0_i32_0 : i32, i32
  }
}

</mosaic_0001>

<bundles_post_ra>
// kernel: tpu_custom_call.1
= control target key start
LH: loop header
LB: loop body
LE: loop exit
PB: predicated region body
PF: predicated region fallthrough
CT: control target
= control target key end

     0   :  { %7 = vsyncpa [#allocation6], 0  ;;  %s562_s9 = smov 0   ;;  %s629_s0 = inlined_call_operand.vmem [shape: f32[16,16], index: 0, kind: input, shape index: {}]   ;;  %s630_s1 = inlined_call_operand.vmem [shape: s32[16,1], index: 1, kind: input, shape index: {}]   ;;  %s631_s2 = inlined_call_operand.hbm [shape: f32[1,1], index: 2, kind: output, shape index: {}]  }
   0x1 LB: > { %s568_s10 = sadd.s32 4294967295, %s538_s9   ;;  %p432_p0 = scmp.ge.s32.totalorder %s538_s9, 1  ;;  %s538_s9 = sphi %s562_s9, %s13_s9  }
   0x2   : > { %p116_p1 = scmp.lt.s32.totalorder %s538_s9, 3 }
   0x4   : > { %p117_p2 = pnand %p432_p0, %p116_p1 }
   0x5   : > { %p136_p3 = scmp.lt.s32.totalorder (!%p117_p2), %s568_s10, 1  ;;  %v540_v0 = vmov (!%p117_p2), 0   ;;  %v146_v3 = vlaneseq (!%p117_p2)  ;;  %v541_v6 = vmov (!%p117_p2), 0.0   ;;  %p436_p4 = scmp.ne.s32.totalorder (!%p117_p2), %s568_s10, 0 }
   0x6   : > { %120 = sbr.rel (%p117_p2) target bundleno = 1304 (0x518), region = 28  ;;  %477 = vset.pattern.permute.xlu0 (!%p117_p2), %v540_v0 }
   0x7   : > { %v581_v4 = vand.u32 (!%p117_p2), 127, %v146_v3 }
   0xd   : > { %s137_s11 = scalar_select %p136_p3, %s568_s10, 1 }
   0xe   : > { %vm158_vm1 = vcmask (!%p436_p4), 130048   ;;  %v542_v8 = vmov (!%p436_p4), 0.0  }
   0xf   : > { %s433_s12 = sshll.u32 %s137_s11, 3  ;;  %159 = vst.msk [vmem:[#allocation2] sm:$0xff] (!%p436_p4), %vm158_vm1, %v542_v8 }
  0x10   : > { %s143_s15 = scalar_lea.vmem %s630_s1, %s433_s12  ;;  %s139_s18 = scalar_lea.vmem %s629_s0, %s433_s12 }
  0x11   : > { %v145_v1 = vld [vmem:[%s143_s15] sm:$0xff] }
  0x12   : > { %v144_v2 = vld [vmem:[%s139_s18] sm:$0xff]  ;;  %149 = vperm.xlu0 %477, %v145_v1  }
  0x8d   : > { %157 = sbr.rel (%p436_p4) target bundleno = 148 (0x94), region = 32 }
  0x91   : > { %v150_v5 = vpop.permute.xlu0 %149 }
  0x92   : > { %vm151_vm0 = vcmp.eq.s32.totalorder %v581_v4, %v150_v5 }
  0x93   : > { %v435_v7 = vsel %vm151_vm0, 1.0, %v541_v6 }
  0x94 PF: > { %vm164_vm2 = vcmask 130048   ;;  %v160_v9 = vsub.f32 %v144_v2, %v435_v7  ;;  %v162_v11 = vld [vmem:[#allocation2] sm:$0xff]  ;;  %vm543_vm9 = vmmov 1   ;;  %vm306_vm1 = vcmask 57344   ;;  %s449_s19 = scalar_lea.vmem [#allocation4], %s538_s9  ;;  %s446_s20 = scalar_lea.vmem [#allocation3], %s538_s9 }
  0x95   : > { %v166_v10 = vsel %vm164_vm2, %v144_v2, -inf  ;;  %p440_p5 = scmp.ne.s32.totalorder %s568_s10, 1 }
  0x96   : > { %167 = vmax.xlane.f32.xlu0 %v166_v10  ;;  %v161_v12 = vand.u32 2147483647, %v160_v9  ;;  %s544_s21 = smov (!%p440_p5), 8   ;;  %s545_s22 = smov (!%p440_p5), 120  }
  0x98   : > { %v163_v13 = vadd.f32 %v162_v11, %v161_v12 }
  0x9a   : > { %165 = vst.msk [vmem:[#allocation2] sm:$0xff] %vm164_vm2, %v163_v13 }
 0x123   : > { %v168_v14 = vpop.xlane.xlu0 %167 }
 0x124   : > { %v169_v15 = vsub.f32 %v144_v2, %v168_v14 }
 0x126   : > { %v170_v16 = vmul.f32 1.442695, %v169_v15 }
 0x128   : > { %478 = vpow2.f32 %v170_v16 }
 0x132   : > { %v479_v17 = vpop.eup %478 }
 0x133   : > { %v172_v18 = vsel %vm164_vm2, %v479_v17, 0.0 }
 0x134   : > { %173 = vadd.xlane.f32.xlu0 %v172_v18 }
 0x1c1   : > { %v174_v19 = vpop.xlane.xlu0 %173 }
 0x1c2   : > { %480 = vlog2.f32 %v174_v19 }
 0x1cc   : > { %v481_v20 = vpop.eup %480 }
 0x1cd   : > { %v176_v21 = vmul.f32 0.6931472, %v481_v20 }
 0x1cf   : > { %v177_v22 = vadd.f32 %v176_v21, %v168_v14 }
 0x1d1   : > { %v178_v23 = vsub.f32 %v177_v22, %v144_v2 }
 0x1d3   : > { %v179_v24 = vmul.f32 %v435_v7, %v178_v23 }
 0x1d5   : > { %v180_v25 = vsel %vm164_vm2, %v179_v24, 0.0 }
 0x1d6   : > { %181 = vadd.xlane.f32.xlu1 %v180_v25 }
 0x263   : > { %v182_v26 = vpop.xlane.xlu1 %181 }
 0x264   : > { %v437_v27 = vadd.f32 -2.7725887, %v182_v26 }
 0x266   : > { %v184_v28 = vmax.f32 %v437_v27, -0.7357589 }
 0x268   : > { %v589_v29 = vmul.f32 0.5, %v184_v28 }
 0x26a   : > { %v186_v30 = vmul.f32 2.7182817, %v589_v29  ;;  %v213_v31 = vmax.f32 %v589_v29, 1e-30  ;;  %v203_v35 = vmax.f32 %v589_v29, 0.0  ;;  %vm220_vm7 = vcmp.lt.f32.partialorder %v589_v29, 0.0 }
 0x26b   : > { %vm221_vm6 = vcmp.lt.f32.partialorder %v589_v29, 2.7182817 }
 0x26c   : > { %v187_v32 = vadd.f32 1.0, %v186_v30  ;;  %482 = vlog2.f32 %v213_v31  ;;  %v204_v36 = vadd.f32 1.0, %v203_v35  ;;  %v207_v46 = vmul.f32 -0.5, %v203_v35 }
 0x26d   : > { %v210_v52 = vand.u32 2147483647, %v203_v35 }
 0x26e   : > { %v188_v33 = vmax.f32 %v187_v32, 0.0  ;;  %v208_v50 = vadd.f32 1.0, %v207_v46 }
 0x26f   : > { %vm211_vm5 = vcmp.lt.f32.partialorder %v210_v52, 0.0004427343 }
 0x270   : > { %v189_v34 = vmul.f32 2.0, %v188_v33  ;;  %v209_v57 = vmul.f32 %v208_v50, %v203_v35 }
 0x272   : > { %484 = vrsqrt.f32 %v189_v34  ;;  %vm192_vm3 = vcmp.eq.f32.partialorder %v189_v34, inf  ;;  %v195_v42 = vand.u32 2147483648, %v189_v34  ;;  %vm194_vm4 = vcmp.eq.f32.partialorder %v189_v34, 0.0 }
 0x273   : > { %486 = vlog2.f32 %v204_v36 }
 0x276   : > { %v483_v37 = vpop.eup %482 }
 0x277   : > { %v215_v38 = vmul.f32 0.6931472, %v483_v37 }
 0x279   : > { %v216_v39 = vmax.f32 %v215_v38, 1e-30 }
 0x27b   : > { %488 = vlog2.f32 %v216_v39 }
 0x27c   : > { %v485_v40 = vpop.eup %484 }
 0x27d   : > { %v191_v41 = vmul.f32 %v485_v40, %v189_v34  ;;  %v487_v48 = vpop.eup %486 }
 0x27e   : > { %v206_v54 = vmul.f32 0.6931472, %v487_v48 }
 0x27f   : > { %v193_v43 = vsel %vm192_vm3, %v189_v34, %v191_v41  ;;  %vm322_vm3 = vcmask (!%p440_p5), 58368  }
 0x280   : > { %v196_v44 = vsel %vm194_vm4, %v195_v42, %v193_v43  ;;  %v212_v60 = vsel %vm211_vm5, %v209_v57, %v206_v54 }
 0x281   : > { %v197_v45 = vmul.f32 0.15277778, %v196_v44 }
 0x283   : > { %v198_v47 = vadd.f32 -0.33333334, %v197_v45 }
 0x285   : > { %v199_v49 = vmul.f32 %v198_v47, %v196_v44  ;;  %v489_v51 = vpop.eup %488 }
 0x286   : > { %v218_v55 = vmul.f32 0.6931472, %v489_v51 }
 0x287   : > { %v200_v53 = vadd.f32 1.0, %v199_v49 }
 0x288   : > { %v219_v58 = vsub.f32 %v215_v38, %v218_v55 }
 0x289   : > { %v201_v56 = vmul.f32 %v200_v53, %v196_v44 }
 0x28a   : > { %v222_v61 = vsel %vm221_vm6, %v212_v60, %v219_v58 }
 0x28b   : > { %v202_v59 = vadd.f32 -1.0, %v201_v56 }
 0x28d   : > { %v223_v62 = vsel %vm220_vm7, %v202_v59, %v222_v61 }
 0x28e   : > { %v224_v63 = vmul.f32 1.442695, %v223_v62  ;;  %v228_v0 = vadd.f32 1.0, %v223_v62  ;;  %v230_v7 = vadd.f32 2.0, %v223_v62 }
 0x290   : > { %490 = vpow2.f32 %v224_v63  ;;  %v232_v1 = vmul.f32 2.0, %v228_v0  ;;  %v301_v63 = vshrl.u32 %v146_v3, 7 }
 0x292   : > { %492 = vrcp.f32 %v232_v1  ;;  %v302_v1 = vsub.s32 %v581_v4, %v301_v63 }
 0x29a   : > { %v491_v2 = vpop.eup %490 }
 0x29b   : > { %v226_v5 = vmul.f32 %v491_v2, %v223_v62  ;;  %v229_v10 = vmul.f32 %v491_v2, %v228_v0 }
 0x29c   : > { %v493_v9 = vpop.eup %492 }
 0x29d   : > { %v227_v6 = vsub.f32 %v226_v5, %v589_v29 }
 0x29f   : > { %v231_v8 = vmul.f32 %v230_v7, %v227_v6 }
 0x2a1   : > { %v234_v11 = vmul.f32 %v493_v9, %v231_v8 }
 0x2a3   : > { %v235_v12 = vsub.f32 %v229_v10, %v234_v11 }
 0x2a5   : > { %494 = vrcp.f32 %v235_v12 }
 0x2af   : > { %v495_v13 = vpop.eup %494 }
 0x2b0   : > { %v237_v14 = vmul.f32 %v495_v13, %v227_v6  ;;  %v334_v13 = vld [vmem:[#allocation2] sm:$0xff] (!%p440_p5) }
 0x2b2   : > { %vm238_vm8 = vweird.f32 %v237_v14 }
 0x2b3   : > { %vm239_vm10 = vmxor %vm238_vm8, %vm543_vm9 }
 0x2b4   : > { %v240_v15 = vsel %vm239_vm10, %v237_v14, 0.0  ;;  %v335_v14 = vsel (!%p440_p5), %vm164_vm2, %v334_v13, 0.0 }
 0x2b5   : > { %v241_v16 = vsub.f32 %v223_v62, %v240_v15  ;;  %v336_v15 = vrot.slane (!%p440_p5), %v335_v14, 4 }
 0x2b7   : > { %v242_v17 = vmul.f32 1.442695, %v241_v16  ;;  %v246_v18 = vadd.f32 1.0, %v241_v16  ;;  %v248_v23 = vadd.f32 2.0, %v241_v16 }
 0x2b9   : > { %496 = vpow2.f32 %v242_v17  ;;  %v250_v19 = vmul.f32 2.0, %v246_v18 }
 0x2bb   : > { %498 = vrcp.f32 %v250_v19 }
 0x2c3   : > { %v497_v20 = vpop.eup %496 }
 0x2c4   : > { %v244_v21 = vmul.f32 %v497_v20, %v241_v16  ;;  %v247_v26 = vmul.f32 %v497_v20, %v246_v18 }
 0x2c5   : > { %v499_v25 = vpop.eup %498 }
 0x2c6   : > { %v245_v22 = vsub.f32 %v244_v21, %v589_v29 }
 0x2c8   : > { %v249_v24 = vmul.f32 %v248_v23, %v245_v22 }
 0x2ca   : > { %v252_v27 = vmul.f32 %v499_v25, %v249_v24 }
 0x2cc   : > { %v253_v28 = vsub.f32 %v247_v26, %v252_v27 }
 0x2ce   : > { %500 = vrcp.f32 %v253_v28 }
 0x2d8   : > { %v501_v30 = vpop.eup %500 }
 0x2d9   : > { %v255_v31 = vmul.f32 %v501_v30, %v245_v22 }
 0x2db   : > { %vm256_vm11 = vweird.f32 %v255_v31 }
 0x2dc   : > { %vm257_vm12 = vmxor %vm256_vm11, %vm543_vm9 }
 0x2dd   : > { %v258_v32 = vsel %vm257_vm12, %v255_v31, 0.0 }
 0x2de   : > { %v259_v33 = vsub.f32 %v241_v16, %v258_v32  ;;  %v337_v16 = vadd.f32 (!%p440_p5), %v336_v15, %v335_v14 }
 0x2e0   : > { %v260_v34 = vmul.f32 1.442695, %v259_v33  ;;  %v264_v35 = vadd.f32 1.0, %v259_v33  ;;  %v266_v40 = vadd.f32 2.0, %v259_v33  ;;  %v338_v17 = vrot.slane (!%p440_p5), %v337_v16, 2 }
 0x2e2   : > { %502 = vpow2.f32 %v260_v34  ;;  %v268_v36 = vmul.f32 2.0, %v264_v35  ;;  %v339_v18 = vadd.f32 (!%p440_p5), %v338_v17, %v337_v16 }
 0x2e4   : > { %504 = vrcp.f32 %v268_v36  ;;  %v340_v19 = vrot.slane (!%p440_p5), %v339_v18, 1 }
 0x2e6   : > { %v341_v20 = vadd.f32 (!%p440_p5), %v340_v19, %v339_v18 }
 0x2e8   : > { %v441_v21 = vadd.f32 (!%p440_p5), -44.36142, %v341_v20 }
 0x2ec   : > { %v503_v37 = vpop.eup %502 }
 0x2ed   : > { %v262_v38 = vmul.f32 %v503_v37, %v259_v33  ;;  %v265_v43 = vmul.f32 %v503_v37, %v264_v35 }
 0x2ee   : > { %v505_v42 = vpop.eup %504 }
 0x2ef   : > { %v263_v39 = vsub.f32 %v262_v38, %v589_v29 }
 0x2f1   : > { %v267_v41 = vmul.f32 %v266_v40, %v263_v39 }
 0x2f3   : > { %v270_v44 = vmul.f32 %v505_v42, %v267_v41 }
 0x2f5   : > { %v271_v45 = vsub.f32 %v265_v43, %v270_v44 }
 0x2f7   : > { %506 = vrcp.f32 %v271_v45 }
 0x301   : > { %v507_v46 = vpop.eup %506 }
 0x302   : > { %v273_v47 = vmul.f32 %v507_v46, %v263_v39 }
 0x304   : > { %vm274_vm13 = vweird.f32 %v273_v47 }
 0x305   : > { %vm275_vm14 = vmxor %vm274_vm13, %vm543_vm9 }
 0x306   : > { %v276_v48 = vsel %vm275_vm14, %v273_v47, 0.0 }
 0x307   : > { %v277_v49 = vsub.f32 %v259_v33, %v276_v48 }
 0x309   : > { %v278_v50 = vmul.f32 1.442695, %v277_v49  ;;  %v282_v51 = vadd.f32 1.0, %v277_v49  ;;  %v284_v56 = vadd.f32 2.0, %v277_v49 }
 0x30b   : > { %508 = vpow2.f32 %v278_v50  ;;  %v286_v52 = vmul.f32 2.0, %v282_v51 }
 0x30d   : > { %510 = vrcp.f32 %v286_v52 }
 0x315   : > { %v509_v53 = vpop.eup %508 }
 0x316   : > { %v280_v54 = vmul.f32 %v509_v53, %v277_v49  ;;  %v283_v59 = vmul.f32 %v509_v53, %v282_v51 }
 0x317   : > { %v511_v58 = vpop.eup %510 }
 0x318   : > { %v281_v55 = vsub.f32 %v280_v54, %v589_v29 }
 0x31a   : > { %v285_v57 = vmul.f32 %v284_v56, %v281_v55 }
 0x31c   : > { %v288_v60 = vmul.f32 %v511_v58, %v285_v57 }
 0x31e   : > { %v289_v61 = vsub.f32 %v283_v59, %v288_v60 }
 0x320   : > { %512 = vrcp.f32 %v289_v61 }
 0x32a   : > { %v513_v62 = vpop.eup %512 }
 0x32b   : > { %v291_v0 = vmul.f32 %v513_v62, %v281_v55 }
 0x32d   : > { %vm292_vm15 = vweird.f32 %v291_v0 }
 0x32e   : > { %vm293_vm0 = vmxor %vm292_vm15, %vm543_vm9 }
 0x32f   : > { %v294_v2 = vsel %vm293_vm0, %v291_v0, 0.0 }
 0x330   : > { %v295_v29 = vsub.f32 %v277_v49, %v294_v2 }
 0x332   : > { %v296_v5 = vsub.f32 0.0, %v295_v29  ;;  %v312_v6 = vrot.slane %v295_v29, %v302_v1 }
 0x334   : > { %v297_v7 = vmul.f32 1.442695, %v296_v5  ;;  %451 = vst.msk [vmem:[%s449_s19 - $0x1] sm:$0x1] %vm306_vm1, %v312_v6 }
 0x336   : > { %514 = vpow2.f32 %v297_v7 }
 0x33b   : > { %v320_v10 = vld [vmem:[#allocation4] sm:$0x3] (!%p440_p5) }
 0x33c   : > { %v321_v11 = vmul.f32 (!%p440_p5), %v320_v10, %v320_v10 }
 0x33d   : > { %319 = sbr.rel (%p440_p5) target bundleno = 1289 (0x509), region = 36 }
 0x33e   : > { %v323_v12 = vsel (!%p440_p5), %vm322_vm3, %v321_v11, 0.0 }
 0x33f   : > { %324 = vadd.xlane.f32.xlu1 (!%p440_p5), %v323_v12 }
 0x340   : > { %v515_v8 = vpop.eup %514 }
 0x341   : > { %v303_v9 = vrot.slane %v515_v8, %v302_v1 }
 0x343   : > { %448 = vst.msk [vmem:[%s446_s20 - $0x1] sm:$0x1] %vm306_vm1, %v303_v9 }
 0x34a   : > { %v343_v3 = vld [vmem:[#allocation3] sm:$0x3] }
 0x34b   : > { %v346_v4 = vrot.slane %v343_v3, 1  ;;  %v344_v24 = vmul.f32 %v441_v21, %v343_v3 }
 0x34d   : > { %347 = vrot.lane.b32.xlu0 %v346_v4, %s544_s21 }
 0x3bf   : > { %v348_v22 = vpop.permute.xlu0 %347 }
 0x3c0   : > { %v350_v23 = vmul.f32 %v441_v21, %v348_v22 }
 0x3c2   : > { %352 = vrot.lane.b32.xlu0 %v350_v23, %s545_s22 }
 0x3cc   : > { %v325_v25 = vpop.xlane.xlu1 %324 }
 0x3cd   : > { %v326_v28 = vrot.slane %v325_v25, 4 }
 0x3cf   : > { %v327_v31 = vadd.f32 %v326_v28, %v325_v25 }
 0x3d1   : > { %v328_v32 = vrot.slane %v327_v31, 2 }
 0x3d3   : > { %v329_v33 = vadd.f32 %v328_v32, %v327_v31 }
 0x3d5   : > { %v330_v34 = vrot.slane %v329_v33, 1 }
 0x3d7   : > { %v331_v35 = vadd.f32 %v330_v34, %v329_v33 }
 0x3d9   : > { %452 = vpush %v331_v35 }
 0x40a   : > { %s453_s23 = spop %452 }
 0x40b   : > { %s333_s24 = smul.f32 16.0, %s453_s23 }
 0x434   : > { %v353_v26 = vpop.permute.xlu0 %352 }
 0x435   : > { %v355_v27 = vadd.f32 %v353_v26, %v344_v24 }
 0x437   : > { %v356_v30 = vsel %vm306_vm1, %v355_v27, 0.0 }
 0x438   : > { %357 = vadd.xlane.f32.xlu1 %v356_v30 }
 0x4c5   : > { %v358_v36 = vpop.xlane.xlu1 %357 }
 0x4c6   : > { %v359_v37 = vrot.slane %v358_v36, 4 }
 0x4c8   : > { %v360_v38 = vadd.f32 %v359_v37, %v358_v36 }
 0x4ca   : > { %v361_v39 = vrot.slane %v360_v38, 2 }
 0x4cc   : > { %v362_v40 = vadd.f32 %v361_v39, %v360_v38 }
 0x4ce   : > { %v363_v41 = vrot.slane %v362_v40, 1 }
 0x4d0   : > { %v364_v42 = vadd.f32 %v363_v41, %v362_v40 }
 0x4d2   : > { %454 = vpush %v364_v42 }
 0x503   : > { %s455_s25 = spop %454 }
 0x504   : > { %s366_s26 = sadd.f32 %s455_s25, %s333_s24 }
 0x506   : > { %s367_s27 = smul.f32 0.0625, %s366_s26 }
 0x508   : > { %369 = sst [smem:[#allocation5]] %s367_s27 }
 0x509 PF: > { %p460_p6 = scmp.eq.s32.totalorder %s568_s10, 1  ;;  %s516_s30 = scalar_lea.hbm %s631_s2, 16 }
 0x50a   : > { %p517_p7 = scmp.ne.s32.totalorder %s631_s2, %s516_s30  ;;  %p522_p10 = scmp.lt.u32.totalorder %s516_s30, %s631_s2 }
 0x50c   : > { %p518_p8 = pnand %p517_p7, %p460_p6 }
 0x50e   : > { %p519_p9 = pneg %p518_p8 }
 0x510   : > { %p524_p11 = pnand %p522_p10, %p519_p9 }
 0x512   : > { %527 = shalt.err (!%p524_p11)
}
 0x513   : > { %s546_s7 = smov [#allocation5]  }
 0x514   : > { %457 = dma.smem_to_hbm (%p460_p6), %s546_s7, 16, %s631_s2, [#allocation6]  }
 0x515   : > { %533 = dma.done.wait (%p460_p6), [#allocation6], 16  }
 0x516   : > { %535 = vsyncadd (%p460_p6), [#allocation6], 4294967280 }
 0x517   : > { %383 = sfence }
 0x518 PF: > { %s13_s9 = sadd.s32 1, %s538_s9  }
 0x519   : > { %p10_p12 = scmp.ge.s32.totalorder %s13_s9, 4  }
 0x51b   :  { %12 = sbr.rel (!%p10_p12) target bundleno = 1 (0x1), region = 69 }
 0x522   :  { %389 = vsyncpa [#allocation6], 1 }
 0x523   :  { %391 = vsyncpa [#allocation6 + $0x1], 1 }

</bundles_post_ra>
